<compile_context>
chip_gen: v7x
topology: tpu7x:2x2x1
jax: 0.10.0
libtpu: 0.0.40
codegen_flags: <defaults>
</compile_context>

<pallas_src>
import functools

import jax
import jax.numpy as jnp
from jax import lax
from jax.experimental import pallas as pl
from jax.experimental.pallas import tpu as pltpu


def _focal_kernel(logits_ref, target_ref, loss_ref, *, alpha, gamma, eps, onehot_eps):
    # logits_ref: (C, TL) input dtype, target_ref: (1, TL) int32, loss_ref: (1, TL) f32
    x = logits_ref[...].astype(jnp.float32)                 # (C, TL)
    t = target_ref[...]                                     # (1, TL) int32

    # Numerically stable softmax over the class axis (axis 0), then + eps.
    m = jnp.max(x, axis=0, keepdims=True)                   # (1, TL)
    e = jnp.exp(x - m)                                      # (C, TL)
    denom = jnp.sum(e, axis=0, keepdims=True)               # (1, TL)
    inv = pl.reciprocal(denom, approx=False)                # one EUP reciprocal
    p = e * inv + eps                                       # input_soft

    # one_hot(target) + 1e-6 (kornia one_hot adds eps to every entry).
    classes = lax.broadcasted_iota(jnp.int32, x.shape, 0)   # (C, TL)
    one_hot = (classes == t).astype(jnp.float32) + onehot_eps

    # Focal weight: (1 - p)^gamma. Clamp >= 0 (p may exceed 1 by eps) and use a
    # multiply chain for small integer gamma instead of pow (log+exp on EUP).
    one_minus_p = jnp.maximum(1.0 - p, 0.0)
    g = float(gamma)
    if g == 0.0:
        weight = jnp.ones_like(p)
    elif g.is_integer() and 1.0 <= g <= 8.0:
        weight = one_minus_p
        for _ in range(int(g) - 1):
            weight = weight * one_minus_p
    else:
        weight = jnp.power(one_minus_p, g)

    focal = (-alpha) * weight * jnp.log(p)                  # (C, TL)

    # Per-pixel loss: sum over class dim -> lane-dense (1, TL) store.
    loss_ref[...] = jnp.sum(one_hot * focal, axis=0, keepdims=True)


def _round_up(x, m):
    return (x + m - 1) // m * m


def focal_loss_pallas(logits, target, alpha, gamma=2.0, reduction="none",
                      eps=1e-6, onehot_eps=1e-6,
                      target_block_bytes=4 * 1024 * 1024, max_block_pixels=32768):
    """logits: (B, C, *spatial); target: (B, *spatial) int. reduction in {none, mean, sum}."""
    B, C = logits.shape[0], logits.shape[1]
    spatial = logits.shape[2:]
    P = 1
    for s in spatial:
        P *= s

    # Free reshapes (no transpose): pixels on the lane axis, class dim second.
    x3 = logits.reshape(B, C, P)                      # keep input dtype (bf16 stays bf16)
    t3 = target.reshape(B, 1, P).astype(jnp.int32)

    # Pick a lane-dense pixel block (multiple of 128) sized to ~target_block_bytes
    # of logits per grid step; stays well inside VMEM on v5e/v6e/v7x with
    # double buffering.
    itemsize = jnp.dtype(x3.dtype).itemsize
    tl = (target_block_bytes // max(C * itemsize, 1)) // 128 * 128
    tl = max(128, min(tl, max_block_pixels))
    tl = min(tl, _round_up(P, 128))

    p_pad = _round_up(P, tl)
    if p_pad != P:
        x3 = jnp.pad(x3, ((0, 0), (0, 0), (0, p_pad - P)))
        t3 = jnp.pad(t3, ((0, 0), (0, 0), (0, p_pad - P)))

    grid = (B, p_pad // tl)

    kernel = functools.partial(
        _focal_kernel, alpha=float(alpha), gamma=float(gamma),
        eps=float(eps), onehot_eps=float(onehot_eps))

    loss3 = pl.pallas_call(
        kernel,
        out_shape=jax.ShapeDtypeStruct((B, 1, p_pad), jnp.float32),
        grid=grid,
        in_specs=[
            pl.BlockSpec((None, C, tl), lambda b, j: (b, 0, j)),
            pl.BlockSpec((None, 1, tl), lambda b, j: (b, 0, j)),
        ],
        out_specs=pl.BlockSpec((None, 1, tl), lambda b, j: (b, 0, j)),
        compiler_params=pltpu.CompilerParams(
            dimension_semantics=("parallel", "parallel")),
    )(x3, t3)

    loss = loss3[:, 0, :P].reshape((B,) + spatial)

    if reduction == "none":
        return loss
    elif reduction == "mean":
        return jnp.mean(loss)
    elif reduction == "sum":
        return jnp.sum(loss)
    else:
        raise NotImplementedError(f"Invalid reduction mode: {reduction}")


class FocalLoss:
    """JAX/Pallas equivalent of the PyTorch FocalLoss module (forward only)."""

    def __init__(self, alpha: float, gamma: float = 2.0, reduction: str = "none"):
        self.alpha = alpha
        self.gamma = gamma
        self.reduction = reduction
        self.eps = 1e-6  # module eps -> focal_loss eps; one_hot eps is also 1e-6

    def __call__(self, logits, target):
        return focal_loss_pallas(logits, target, self.alpha, self.gamma,
                                 self.reduction, eps=self.eps, onehot_eps=1e-6)


def _reference(logits, target, alpha, gamma=2.0, eps=1e-6, onehot_eps=1e-6):
    # pure-JAX reference mirroring the PyTorch code (for sanity checking)
    p = jax.nn.softmax(logits.astype(jnp.float32), axis=1) + eps
    oh = jax.nn.one_hot(target, logits.shape[1], axis=1, dtype=jnp.float32) + onehot_eps
    weight = jnp.power(jnp.maximum(1.0 - p, 0.0), gamma)
    focal = -alpha * weight * jnp.log(p)
    return jnp.sum(oh * focal, axis=1)


if __name__ == "__main__":
    B, C, H, W = 2, 4, 16, 16
    key = jax.random.PRNGKey(0)
    k1, k2 = jax.random.split(key)
    logits = jax.random.normal(k1, (B, C, H, W), dtype=jnp.float32)
    target = jax.random.randint(k2, (B, H, W), 0, C, dtype=jnp.int32)

    loss_fn = FocalLoss(alpha=0.5, gamma=2.0, reduction="none")
    out = loss_fn(logits, target)
    out = jax.block_until_ready(out)

    ref = _reference(logits, target, alpha=0.5, gamma=2.0)
    assert out.shape == (B, H, W), out.shape
    assert jnp.allclose(out, ref, atol=1e-5, rtol=1e-5), float(jnp.max(jnp.abs(out - ref)))
    print("KERNEL_OK")
</pallas_src>

<mosaic_0001>
module attributes {stable_mosaic.version = 11 : i64} {
  func.func @_focal_kernel(%arg0: i32, %arg1: i32, %arg2: memref<1x4x256xf32, #tpu.memory_space<vmem>>, %arg3: memref<1x1x256xi32, #tpu.memory_space<vmem>>, %arg4: memref<1x1x256xf32, #tpu.memory_space<vmem>>) attributes {dimension_semantics = [#tpu.dimension_semantics<parallel>, #tpu.dimension_semantics<parallel>], iteration_bounds = array<i64: 2, 1>, scalar_prefetch = 0 : i64, scratch_operands = 0 : i64, tpu.core_type = #tpu.core_type<tc>, window_params = [{transform_indices = @transform_0, window_bounds = array<i64: 1, 4, 256>}, {transform_indices = @transform_1, window_bounds = array<i64: 1, 1, 256>}, {transform_indices = @transform_2, window_bounds = array<i64: 1, 1, 256>}]} {
    %c0 = arith.constant 0 : index
    %c0_0 = arith.constant 0 : index
    %c0_1 = arith.constant 0 : index
    %0 = vector.load %arg2[%c0, %c0_0, %c0_1] : memref<1x4x256xf32, #tpu.memory_space<vmem>>, vector<1x4x256xf32>
    %1 = vector.shape_cast %0 : vector<1x4x256xf32> to vector<4x256xf32>
    %c0_2 = arith.constant 0 : index
    %c0_3 = arith.constant 0 : index
    %c0_4 = arith.constant 0 : index
    %2 = vector.load %arg3[%c0_2, %c0_3, %c0_4] : memref<1x1x256xi32, #tpu.memory_space<vmem>>, vector<1x1x256xi32>
    %3 = vector.shape_cast %2 : vector<1x1x256xi32> to vector<1x256xi32>
    %cst = arith.constant dense<0xFF800000> : vector<256xf32>
    %4 = vector.multi_reduction <maximumf>, %1, %cst [0] : vector<4x256xf32> to vector<256xf32>
    %5 = vector.shape_cast %4 : vector<256xf32> to vector<1x256xf32>
    %6 = vector.broadcast %5 : vector<1x256xf32> to vector<4x256xf32>
    %7 = arith.subf %1, %6 : vector<4x256xf32>
    %8 = math.exp %7 : vector<4x256xf32>
    %cst_5 = arith.constant dense<0.000000e+00> : vector<256xf32>
    %9 = vector.multi_reduction <add>, %8, %cst_5 [0] : vector<4x256xf32> to vector<256xf32>
    %10 = vector.shape_cast %9 : vector<256xf32> to vector<1x256xf32>
    %11 = tpu.reciprocal %10 : vector<1x256xf32> -> vector<1x256xf32>
    %12 = vector.broadcast %11 : vector<1x256xf32> to vector<4x256xf32>
    %13 = arith.mulf %8, %12 : vector<4x256xf32>
    %cst_6 = arith.constant 9.99999997E-7 : f32
    %14 = vector.broadcast %cst_6 : f32 to vector<4x256xf32>
    %15 = arith.addf %13, %14 : vector<4x256xf32>
    %16 = tpu.iota {dimensions = array<i32: 0>} : vector<4x256xi32>
    %17 = vector.broadcast %3 : vector<1x256xi32> to vector<4x256xi32>
    %18 = arith.cmpi eq, %16, %17 : vector<4x256xi32>
    %19 = arith.extui %18 : vector<4x256xi1> to vector<4x256xi32>
    %20 = arith.sitofp %19 : vector<4x256xi32> to vector<4x256xf32>
    %cst_7 = arith.constant 9.99999997E-7 : f32
    %21 = vector.broadcast %cst_7 : f32 to vector<4x256xf32>
    %22 = arith.addf %20, %21 : vector<4x256xf32>
    %cst_8 = arith.constant 1.000000e+00 : f32
    %23 = vector.broadcast %cst_8 : f32 to vector<4x256xf32>
    %24 = arith.subf %23, %15 : vector<4x256xf32>
    %cst_9 = arith.constant 0.000000e+00 : f32
    %25 = vector.broadcast %cst_9 : f32 to vector<4x256xf32>
    %26 = arith.maximumf %24, %25 : vector<4x256xf32>
    %27 = arith.mulf %26, %26 : vector<4x256xf32>
    %cst_10 = arith.constant -5.000000e-01 : f32
    %28 = vector.broadcast %cst_10 : f32 to vector<4x256xf32>
    %29 = arith.mulf %28, %27 : vector<4x256xf32>
    %30 = math.log %15 : vector<4x256xf32>
    %31 = arith.mulf %29, %30 : vector<4x256xf32>
    %32 = arith.mulf %22, %31 : vector<4x256xf32>
    %cst_11 = arith.constant dense<0.000000e+00> : vector<256xf32>
    %33 = vector.multi_reduction <add>, %32, %cst_11 [0] : vector<4x256xf32> to vector<256xf32>
    %34 = vector.shape_cast %33 : vector<256xf32> to vector<1x256xf32>
    %c0_12 = arith.constant 0 : index
    %c0_13 = arith.constant 0 : index
    %c0_14 = arith.constant 0 : index
    %35 = vector.load %arg4[%c0_12, %c0_13, %c0_14] : memref<1x1x256xf32, #tpu.memory_space<vmem>>, vector<1x1x256xf32>
    %36 = vector.shape_cast %35 : vector<1x1x256xf32> to vector<1x256xf32>
    %37 = vector.shape_cast %34 : vector<1x256xf32> to vector<1x1x256xf32>
    tpu.vector_store %arg4[%c0_12, %c0_13, %c0_14], %37 {strides = array<i32>} : memref<1x1x256xf32, #tpu.memory_space<vmem>>, vector<1x1x256xf32>,
    return
  }
  func.func @transform_0(%arg0: i32, %arg1: i32) -> (i32, i32, i32) {
    %c0_i32 = arith.constant 0 : i32
    %c0_i32_0 = arith.constant 0 : i32
    return %arg0, %c0_i32, %arg1 : i32, i32, i32
  }
  func.func @transform_1(%arg0: i32, %arg1: i32) -> (i32, i32, i32) {
    %c0_i32 = arith.constant 0 : i32
    %c0_i32_0 = arith.constant 0 : i32
    return %arg0, %c0_i32, %arg1 : i32, i32, i32
  }
  func.func @transform_2(%arg0: i32, %arg1: i32) -> (i32, i32, i32) {
    %c0_i32 = arith.constant 0 : i32
    %c0_i32_0 = arith.constant 0 : i32
    return %arg0, %c0_i32, %arg1 : i32, i32, i32
  }
}

</mosaic_0001>

<bundles_post_ra>
// kernel: tpu_custom_call.1
= control target key start
LH: loop header
LB: loop body
LE: loop exit
PB: predicated region body
PF: predicated region fallthrough
CT: control target
= control target key end

     0   :  { %7 = vsyncpa [#allocation3], 0  ;;  %s967_s0 = inlined_call_operand.hbm [shape: f32[2,4,256], index: 0, kind: input, shape index: {}]   ;;  %s968_s1 = inlined_call_operand.hbm [shape: s32[2,1,256], index: 1, kind: input, shape index: {}]   ;;  %s969_s2 = inlined_call_operand.hbm [shape: f32[2,1,256], index: 2, kind: output, shape index: {}]  }
   0x1   :  { %9 = vsyncpa [#allocation3 + $0x1], 0 }
   0x2   :  { %10 = vsyncpa [#allocation6], 0 }
   0x3   :  { %12 = vsyncpa [#allocation6 + $0x1], 0 }
   0x4   :  { %13 = vsyncpa [#allocation4], 0 }
   0x5   :  { %15 = vsyncpa [#allocation4 + $0x1], 0  ;;  %s739_s9 = smov 0   ;;  %s741_s10 = smov 0  }
   0x6   :  { %s743_s11 = smov 0   ;;  %s745_s12 = smov 0  }
   0x7   :  { %s747_s13 = smov 0   ;;  %s749_s14 = smov 0  }
   0x8 LB: > { %s469_s15 = sadd.s32 4294967295, %s717_s14   ;;  %s470_s16 = sadd.s32 4294967294, %s717_s14   ;;  %s717_s14 = sphi %s749_s14, %s21_s14   ;;  %s713_s13 = sphi %s747_s13, %s989_s13   ;;  %s709_s12 = sphi %s745_s12, %s988_s12   ;;  %s705_s11 = sphi %s743_s11, %s987_s11   ;;  %s701_s10 = sphi %s741_s10, %s986_s10   ;;  %s697_s9 = sphi %s739_s9, %s985_s9  }
   0x9   : > { %s33_s17 = sadd.s32 1, %s713_s13  ;;  %s42_s18 = sadd.s32 1, %s705_s11 }
   0xa   : > { %p35_p0 = scmp.ge.s32.totalorder %s33_s17, 2  ;;  %p49_p1 = scmp.ne.s32.totalorder %s705_s11, %s701_s10 }
   0xb   : > { %p50_p2 = scmp.eq.s32.totalorder %s717_s14, 0  ;;  %p55_p3 = scmp.ne.s32.totalorder %s701_s10, %s697_s9 }
   0xc   : > { %s991_s17 = smov (%p35_p0, %s33_s17), 0  ;;  %p56_p5 = scmp.eq.s32.totalorder %s469_s15, 0 }
   0xd   : > { %p780_p4 = por %p50_p2, %p49_p1  ;;  %s37_s20 = ssub.s32 %s713_s13, %s991_s17 }
   0xe   : > { %p109_p6 = scmp.eq.s32.totalorder %s469_s15, 1  ;;  %p40_p7 = scmp.eq.s32.totalorder %s37_s20, 0 }
   0xf   : > { %p786_p8 = por %p56_p5, %p55_p3  ;;  %p115_p10 = scmp.eq.s32.totalorder %s470_s16, 1 }
  0x10   : > { %p790_p9 = por %p109_p6, %p49_p1  ;;  %p510_p13 = scmp.lt.s32.totalorder %s717_s14, 2 }
  0x11   : > { %s973_s21 = scalar_select %p786_p8, 1, 0 }
  0x12   : > { %s974_s22 = scalar_select %p790_p9, 1, 0 }
  0x13   : > { %s795_s23 = scalar_select %p40_p7, %s705_s11, %s42_s18  }
  0x14   : > { %p797_p11 = por %p115_p10, %p55_p3  ;;  %s804_s25 = sand.u32 1, %s705_s11  }
  0x15   : > { %s473_s26 = sshll.u32 %s804_s25, 3  ;;  %s490_s27 = sshll.u32 %s713_s13, 7 }
  0x16   : > { %s975_s24 = scalar_select %p797_p11, 1, 0 }
  0x17   : > { %s811_s30 = scalar_lea.hbm %s967_s0, %s490_s27  ;;  %s139_s3 = scalar_lea.vmem [#allocation2], %s473_s26 }
  0x18   : > { %s149_s4 = sshll.u32 %s139_s3, 4  ;;  %p817_p0 = pnand %p510_p13, %p780_p4  ;;  %s813_s4 = int_to_ptr.vmem [resolvable:$true] %s149_s4 }
  0x19   : > { %s136_s6 = scalar_lea.sflag [#allocation3], %s804_s25  ;;  %s571_s7 = scalar_lea.hbm %s811_s30, 128 }
  0x1a   : > { %p572_p3 = scmp.ne.s32.totalorder %s811_s30, %s571_s7  ;;  %p573_p5 = pneg %p817_p0 }
  0x1b   : > { %s576_s16 = scalar_lea.hbm %s967_s0, 256  ;;  %p577_p4 = scmp.lt.u32.totalorder %s811_s30, %s967_s0 }
  0x1c   : > { %p574_p6 = pnand %p573_p5, %p572_p3  ;;  %p578_p10 = scmp.lt.u32.totalorder %s576_s16, %s571_s7 }
  0x1d   : > { %p580_p12 = scmp.lt.u32.totalorder %s571_s7, %s811_s30 }
  0x1e   : > { %p575_p7 = pneg %p574_p6  ;;  %p579_p13 = por %p578_p10, %p577_p4 }
  0x20   : > { %p581_p1 = por %p580_p12, %p579_p13 }
  0x22   : > { %p582_p2 = pnand %p581_p1, %p575_p7 }
  0x24   : > { %585 = shalt.err (!%p582_p2)
}
  0x25   : > { %s586_s20 = scalar_lea.vmem %s813_s4, 128  ;;  %s719_s26 = smov [#allocation2]  }
  0x26   : > { %p587_p3 = scmp.ne.s32.totalorder %s813_s4, %s586_s20  ;;  %s591_s27 = sshll.u32 %s719_s26, 4  ;;  %s592_s27 = int_to_ptr.vmem [resolvable:$false] %s591_s27 }
  0x27   : > { %s593_s28 = scalar_lea.vmem %s592_s27, 256  ;;  %p594_p9 = scmp.lt.s32.totalorder %s813_s4, %s592_s27 }
  0x28   : > { %p589_p6 = pnand %p587_p3, %p573_p5  ;;  %p595_p4 = scmp.lt.s32.totalorder %s593_s28, %s586_s20 }
  0x2a   : > { %p590_p11 = pneg %p589_p6  ;;  %p596_p10 = por %p595_p4, %p594_p9 }
  0x2c   : > { %p597_p12 = pnand %p596_p10, %p590_p11 }
  0x2e   : > { %600 = shalt.err (!%p597_p12)
}
  0x2f   : > { %502 = dma.hbm_to_vmem [thread:$0]  (!%p817_p0), %s811_s30, 128, %s813_s4, %s136_s6  }
  0x30   : > { %p977_p1 = scmp.lt.s32.totalorder %s717_s14, 3  ;;  %p978_p2 = scmp.ge.s32.totalorder %s717_s14, 1 }
  0x31   : > { %s476_s3 = sshll.u32 %s804_s25, 1  ;;  %s491_s7 = sshll.u32 %s713_s13, 5 }
  0x32   : > { %p853_p7 = pnand %p978_p2, %p977_p1  ;;  %s862_s16 = scalar_lea.hbm %s968_s1, %s491_s7 }
  0x33   : > { %s160_s18 = scalar_lea.vmem [#allocation5], %s476_s3  ;;  %s157_s30 = scalar_lea.sflag [#allocation6], %s804_s25 }
  0x34   : > { %s979_s29 = scalar_select %p853_p7, 1, 0 }
  0x35   : > { %s170_s19 = sshll.u32 %s160_s18, 4  ;;  %s601_s4 = scalar_lea.hbm %s862_s16, 32  ;;  %s171_s19 = int_to_ptr.vmem [resolvable:$true] %s170_s19 }
  0x36   : > { %p602_p9 = scmp.ne.s32.totalorder %s862_s16, %s601_s4  ;;  %s606_s26 = scalar_lea.hbm %s968_s1, 64 }
  0x37   : > { %p607_p3 = scmp.lt.u32.totalorder %s862_s16, %s968_s1  ;;  %p608_p6 = scmp.lt.u32.totalorder %s606_s26, %s601_s4 }
  0x38   : > { %p604_p11 = pnand %p602_p9, %p573_p5  ;;  %p610_p10 = scmp.lt.u32.totalorder %s601_s4, %s862_s16 }
  0x39   : > { %p609_p4 = por %p608_p6, %p607_p3 }
  0x3a   : > { %p605_p13 = pneg %p604_p11 }
  0x3b   : > { %p611_p12 = por %p610_p10, %p609_p4 }
  0x3d   : > { %p612_p1 = pnand %p611_p12, %p605_p13 }
  0x3f   : > { %615 = shalt.err (!%p612_p1)
}
  0x40   : > { %s616_s25 = scalar_lea.vmem %s171_s19, 32  ;;  %s720_s3 = smov [#allocation5]  }
  0x41   : > { %p617_p2 = scmp.ne.s32.totalorder %s171_s19, %s616_s25  ;;  %s621_s7 = sshll.u32 %s720_s3, 4  ;;  %s622_s7 = int_to_ptr.vmem [resolvable:$false] %s621_s7 }
  0x42   : > { %s623_s8 = scalar_lea.vmem %s622_s7, 64  ;;  %p624_p8 = scmp.lt.s32.totalorder %s171_s19, %s622_s7 }
  0x43   : > { %p619_p9 = pnand %p617_p2, %p573_p5  ;;  %p625_p7 = scmp.lt.s32.totalorder %s623_s8, %s616_s25 }
  0x45   : > { %p620_p11 = pneg %p619_p9  ;;  %p626_p3 = por %p625_p7, %p624_p8 }
  0x47   : > { %p627_p6 = pnand %p626_p3, %p620_p11 }
  0x49   : > { %630 = shalt.err (!%p627_p6)
}
  0x4a   : > { %505 = dma.hbm_to_vmem [thread:$0]  (!%p817_p0), %s862_s16, 32, %s171_s19, %s157_s30  }
  0x4b   : > { %p980_p13 = scmp.ne.s32.totalorder %s979_s29, 0 }
  0x4c   : > { %s887_s15 = sand.u32 (!%p980_p13), 1, %s701_s10   ;;  %p981_p5 = scmp.ne.s32.totalorder (!%p980_p13), %s973_s21, 0 }
  0x4d   : > { %179 = sbr.rel (%p980_p13) target bundleno = 205 (0xcd), region = 28  ;;  %s480_s18 = sshll.u32 (!%p980_p13), %s887_s15, 3 }
  0x4e   : > { %s182_s4 = scalar_lea.sflag (!%p980_p13), [#allocation3], %s887_s15  ;;  %s185_s6 = scalar_lea.vmem (!%p980_p13), [#allocation2], %s480_s18 }
  0x54   : > { %684 = dma.done.wait (%p981_p5), %s182_s4, 128  }
  0x55   : > { %686 = vsyncadd (%p981_p5), %s182_s4, 4294967168  ;;  %s481_s5 = sshll.u32 %s887_s15, 1  ;;  %s191_s29 = scalar_lea.sflag [#allocation6], %s887_s15 }
  0x56   : > { %s899_s16 = scalar_lea.vmem [#allocation5], %s481_s5 }
  0x57   : > { %688 = dma.done.wait (%p981_p5), %s191_s29, 32  }
  0x58   : > { %690 = vsyncadd (%p981_p5), %s191_s29, 4294967264  ;;  %vm228_vm0 = vcmask 1043456   ;;  %v223_v0 = vld [vmem:[%s185_s6] sm:$0xff]  ;;  %v275_v35 = vlaneseq  ;;  %v224_v42 = vld [vmem:[%s899_s16] sm:$0x3]  ;;  %v721_v50 = vmov 0.0  }
  0x59   : > { %v226_v1 = vcombine.high %v223_v0, %v223_v0  ;;  %v229_v2 = vsel %vm228_vm0, %v223_v0, -inf  ;;  %s219_s21 = scalar_lea.vmem [#allocation7], %s481_s5  ;;  %s492_s30 = sshll.u32 %s709_s12, 5 }
  0x5a   : > { %v230_v3 = vrot.slane %v229_v2, 4  ;;  %v276_v38 = vshrl.u32 %v275_v35, 7  ;;  %s359_s19 = sshll.u32 %s219_s21, 4  ;;  %vm339_vm3 = vcmp.lt.s32.totalorder %v275_v35, 256  ;;  %s920_s27 = scalar_lea.hbm %s969_s2, %s492_s30  ;;  %s915_s19 = int_to_ptr.vmem [resolvable:$true] %s359_s19 }
  0x5b   : > { %v236_v4 = vsel %vm228_vm0, %v226_v1, -inf  ;;  %s343_s28 = scalar_lea.sflag [#allocation4], %s887_s15  ;;  %s631_s25 = scalar_lea.vmem %s915_s19, 32 }
  0x5c   : > { %v231_v5 = vmax.f32 %v229_v2, %v230_v3  ;;  %v237_v6 = vrot.slane %v236_v4, 4  ;;  %v279_v41 = vsub.s32 0, %v276_v38  ;;  %v283_v44 = vsub.s32 1, %v276_v38  ;;  %p632_p8 = scmp.ne.s32.totalorder %s915_s19, %s631_s25  ;;  %p982_p0 = scmp.ne.s32.totalorder %s974_s22, 0 }
  0x5d   : > { %s723_s12 = smov [#allocation7]  }
  0x5e   : > { %v232_v7 = vrot.slane %v231_v5, 2  ;;  %v238_v8 = vmax.f32 %v236_v4, %v237_v6  ;;  %v280_v46 = vrot.slane %v224_v42, %v279_v41  ;;  %v284_v48 = vrot.slane %v224_v42, %v283_v44  ;;  %p633_p7 = pnand %p632_p8, %p982_p0  ;;  %s635_s3 = sshll.u32 %s723_s12, 4  ;;  %s636_s3 = int_to_ptr.vmem [resolvable:$false] %s635_s3 }
  0x5f   : > { %s637_s7 = scalar_lea.vmem %s636_s3, 64  ;;  %p638_p10 = scmp.lt.s32.totalorder %s915_s19, %s636_s3 }
  0x60   : > { %v233_v9 = vmax.f32 %v231_v5, %v232_v7  ;;  %v239_v10 = vrot.slane %v238_v8, 2  ;;  %vm285_vm1 = vcmp.eq.s32.totalorder %v276_v38, %v280_v46  ;;  %vm286_vm2 = vcmp.eq.s32.totalorder %v276_v38, %v284_v48  ;;  %p634_p4 = pneg %p633_p7  ;;  %p639_p12 = scmp.lt.s32.totalorder %s637_s7, %s631_s25 }
  0x61   : > { %v483_v51 = vsel %vm285_vm1, 1.0, %v721_v50  ;;  %v484_v54 = vsel %vm286_vm2, 1.0, %v721_v50  ;;  %v722_v5 = vmov 1966171168  }
  0x62   : > { %v234_v11 = vrot.slane %v233_v9, 1  ;;  %v240_v12 = vmax.f32 %v238_v8, %v239_v10  ;;  %v291_v55 = vadd.f32 1e-06, %v483_v51  ;;  %v292_v57 = vadd.f32 1e-06, %v484_v54  ;;  %p640_p1 = por %p639_p12, %p638_p10 }
  0x63   : > { %v323_v6 = vunpack.c.l.s4 %v722_v5 }
  0x64   : > { %v235_v13 = vmax.f32 %v233_v9, %v234_v11  ;;  %v241_v14 = vrot.slane %v240_v12, 1  ;;  %p641_p2 = pnand %p640_p1, %p634_p4 }
  0x65   : > { %v324_v11 = vunpack.c.0.s8 %v323_v6 }
  0x66   : > { %v242_v15 = vmax.f32 %v240_v12, %v241_v14 }
  0x68   : > { %v245_v16 = vcombine.low %v235_v13, %v242_v15  ;;  %v327_v15 = vsub.s32 %v324_v11, %v276_v38 }
  0x6a   : > { %v247_v17 = vsub.f32 %v223_v0, %v245_v16 }
  0x6c   : > { %v248_v18 = vmul.f32 1.442695, %v247_v17 }
  0x6e   : > { %563 = vpow2.f32 %v248_v18 }
  0x78   : > { %v564_v19 = vpop.eup %563 }
  0x79   : > { %v251_v20 = vcombine.high %v564_v19, %v564_v19  ;;  %v253_v21 = vsel %vm228_vm0, %v564_v19, 0.0 }
  0x7a   : > { %v254_v22 = vrot.slane %v253_v21, 4 }
  0x7b   : > { %v260_v23 = vsel %vm228_vm0, %v251_v20, 0.0 }
  0x7c   : > { %v255_v24 = vadd.f32 %v254_v22, %v253_v21  ;;  %v261_v25 = vrot.slane %v260_v23, 4 }
  0x7e   : > { %v256_v26 = vrot.slane %v255_v24, 2  ;;  %v262_v27 = vadd.f32 %v261_v25, %v260_v23 }
  0x80   : > { %v257_v28 = vadd.f32 %v256_v26, %v255_v24  ;;  %v263_v29 = vrot.slane %v262_v27, 2 }
  0x82   : > { %v258_v30 = vrot.slane %v257_v28, 1  ;;  %v264_v31 = vadd.f32 %v263_v29, %v262_v27 }
  0x84   : > { %v259_v32 = vadd.f32 %v258_v30, %v257_v28  ;;  %v265_v33 = vrot.slane %v264_v31, 1 }
  0x86   : > { %v266_v34 = vadd.f32 %v265_v33, %v264_v31  ;;  %565 = vrcp.f32 %v259_v32 }
  0x88   : > { %567 = vrcp.f32 %v266_v34 }
  0x90   : > { %v566_v36 = vpop.eup %565 }
  0x92   : > { %v568_v37 = vpop.eup %567 }
  0x93   : > { %v271_v39 = vcombine.low %v566_v36, %v568_v37 }
  0x95   : > { %v273_v40 = vmul.f32 %v564_v19, %v271_v39 }
  0x97   : > { %v274_v43 = vadd.f32 1e-06, %v273_v40 }
  0x99   : > { %v293_v45 = vsub.f32 1.0, %v274_v43  ;;  %569 = vlog2.f32 %v274_v43 }
  0x9b   : > { %v294_v47 = vmax.f32 %v293_v45, 0.0 }
  0x9d   : > { %v295_v49 = vmul.f32 %v294_v47, %v294_v47 }
  0x9f   : > { %v296_v52 = vmul.f32 -0.5, %v295_v49 }
  0xa3   : > { %v570_v53 = vpop.eup %569 }
  0xa4   : > { %v298_v56 = vmul.f32 0.6931472, %v570_v53 }
  0xa6   : > { %v299_v58 = vmul.f32 %v298_v56, %v296_v52 }
  0xa8   : > { %v301_v59 = vcombine.high %v299_v58, %v299_v58  ;;  %v303_v60 = vmul.f32 %v299_v58, %v291_v55 }
  0xaa   : > { %v304_v61 = vmul.f32 %v301_v59, %v292_v57  ;;  %v305_v62 = vsel %vm228_vm0, %v303_v60, 0.0 }
  0xab   : > { %v306_v63 = vrot.slane %v305_v62, 4 }
  0xac   : > { %v312_v0 = vsel %vm228_vm0, %v304_v61, 0.0 }
  0xad   : > { %v307_v1 = vadd.f32 %v306_v63, %v305_v62  ;;  %v313_v2 = vrot.slane %v312_v0, 4 }
  0xaf   : > { %v308_v3 = vrot.slane %v307_v1, 2  ;;  %v314_v4 = vadd.f32 %v313_v2, %v312_v0 }
  0xb1   : > { %v309_v7 = vadd.f32 %v308_v3, %v307_v1  ;;  %v315_v8 = vrot.slane %v314_v4, 2 }
  0xb3   : > { %v310_v9 = vrot.slane %v309_v7, 1  ;;  %v316_v10 = vadd.f32 %v315_v8, %v314_v4 }
  0xb5   : > { %v311_v12 = vadd.f32 %v310_v9, %v309_v7  ;;  %v317_v13 = vrot.slane %v316_v10, 1 }
  0xb7   : > { %v318_v14 = vadd.f32 %v317_v13, %v316_v10 }
  0xb9   : > { %v321_v16 = vcombine.low %v311_v12, %v318_v14 }
  0xbb   : > { %v328_v17 = vrot.slane %v321_v16, %v327_v15 }
  0xbd   : > { %v335_v18 = vrot.slane %v328_v17, %v327_v15 }
  0xbf   : > { %341 = vst.msk [vmem:[%s219_s21] sm:$0x3] %vm339_vm3, %v335_v18 }
  0xc0   : > { %644 = shalt.err (!%p641_p2)
}
  0xc1   : > { %s645_s8 = scalar_lea.hbm %s920_s27, 32  ;;  %s649_s4 = scalar_lea.hbm %s969_s2, 64 }
  0xc2   : > { %p646_p9 = scmp.ne.s32.totalorder %s920_s27, %s645_s8  ;;  %p650_p6 = scmp.lt.u32.totalorder %s920_s27, %s969_s2 }
  0xc3   : > { %p651_p13 = scmp.lt.u32.totalorder %s649_s4, %s645_s8  ;;  %p653_p8 = scmp.lt.u32.totalorder %s645_s8, %s920_s27 }
  0xc4   : > { %p647_p11 = pnand %p646_p9, %p982_p0 }
  0xc5   : > { %p652_p5 = por %p651_p13, %p650_p6 }
  0xc6   : > { %p648_p3 = pneg %p647_p11 }
  0xc7   : > { %p654_p7 = por %p653_p8, %p652_p5 }
  0xc9   : > { %p655_p4 = pnand %p654_p7, %p648_p3 }
  0xcb   : > { %658 = shalt.err (!%p655_p4)
}
  0xcc   : > { %497 = dma.vmem_to_hbm [thread:$0]  (%p982_p0), %s915_s19, 32, %s920_s27, %s343_s28  }
  0xcd PF: > { %s371_s29 = sand.u32 1, %s697_s9   ;;  %p983_p10 = scmp.ne.s32.totalorder %s975_s24, 0 }
  0xce   : > { %p984_p12 = scmp.ge.s32.totalorder %s717_s14, 2  ;;  %s372_s16 = scalar_lea.sflag [#allocation4], %s371_s29 }
  0xd0   : > { %p507_p1 = pnand %p984_p12, %p983_p10 }
  0xd2   : > { %692 = dma.done.wait (!%p507_p1), %s372_s16, 32  }
  0xd3   : > { %694 = vsyncadd (!%p507_p1), %s372_s16, 4294967264  ;;  %s21_s14 = sadd.s32 1, %s717_s14   ;;  %s985_s9 = smov %s701_s10 }
  0xd4   : > { %p18_p2 = scmp.ge.s32.totalorder %s21_s14, 4   ;;  %s986_s10 = smov %s705_s11 }
  0xd5   : > { %s987_s11 = smov %s795_s23  ;;  %s988_s12 = smov %s713_s13 }
  0xd6   : > { %s989_s13 = smov %s991_s17  ;;  %20 = sbr.rel (!%p18_p2) target bundleno = 8 (0x8), region = 86 }
  0xdd   :  { %377 = vsyncpa [#allocation3], 1 }
  0xde   :  { %379 = vsyncpa [#allocation3 + $0x1], 1 }
  0xdf   :  { %380 = vsyncpa [#allocation6], 1 }
  0xe0   :  { %382 = vsyncpa [#allocation6 + $0x1], 1 }
  0xe1   :  { %383 = vsyncpa [#allocation4], 1 }
  0xe2   :  { %385 = vsyncpa [#allocation4 + $0x1], 1 }

</bundles_post_ra>
